<compile_context>
chip_gen: v6e
topology: v6e:2x2x1
jax: 0.10.0
libtpu: 0.0.40
codegen_flags: <defaults>
</compile_context>

<pallas_src>
import numpy as np
import jax
import jax.numpy as jnp
from jax.experimental import pallas as pl
from jax.experimental.pallas import tpu as pltpu

KH = KW = 3
STRIDE = 2
C_OUT = 32


def _make_conv_kernel(h_out, w_out):
    """Per-image kernel body, specialized to the static output size."""

    def kernel(xq_ref, w_ref, b_ref, o_ref):
        # xq_ref: (H2, W2, 4)   space-to-depth input: xq[i, j, 2a+b] = x[2i+a, 2j+b]
        # w_ref : (9, 1, 1, 32) per-tap weight rows (k = kh*3 + kw)
        # b_ref : (1, 1, 32)
        # o_ref : (H_out, W_out, 32)
        acc = jnp.zeros((h_out, w_out, C_OUT), dtype=jnp.float32)
        for kh in range(KH):            # static 9-tap loop, unrolled at trace time
            for kw in range(KW):
                a, dr = kh & 1, kh >> 1
                b, dc = kw & 1, kw >> 1
                q = 2 * a + b
                # tap[i, j, 0] = x[2*i + kh, 2*j + kw]  (static contiguous slices,
                # stride-2 handled entirely by the space-to-depth decomposition)
                tap = xq_ref[pl.ds(dr, h_out), pl.ds(dc, w_out), pl.ds(q, 1)]
                # (H_out, W_out, 1) * (1, 1, 32) broadcast-MAC on the VPU.
                acc = acc + tap.astype(jnp.float32) * w_ref[kh * KW + kw]
        o_ref[...] = (acc + b_ref[...]).astype(o_ref.dtype)

    return kernel


def torch_conv_forward(x, weight, bias):
    """x: [N, H, W, 1] f32, weight: [C_OUT, 1, KH, KW], bias: [C_OUT] -> [N, Ho, Wo, C_OUT]."""
    N, H, W, C_in = x.shape
    assert C_in == 1
    H_out = (H - KH) // STRIDE + 1
    W_out = (W - KW) // STRIDE + 1

    # ---- space-to-depth view of x (glue: one cheap pass over the small input;
    # no 9x im2col expansion in HBM). xq[n, i, j, 2a+b] = x[n, 2i+a, 2j+b, 0]. ----
    Hp = H + (H % 2)
    Wp = W + (W % 2)
    x_nhw = jnp.pad(x[..., 0], ((0, 0), (0, Hp - H), (0, Wp - W)))
    H2, W2 = Hp // 2, Wp // 2
    xq = (
        x_nhw.reshape(N, H2, 2, W2, 2)
        .transpose(0, 1, 3, 2, 4)
        .reshape(N, H2, W2, 4)
    )

    # weight[c, 0, kh, kw] -> wq[kh*KW + kw, 0, 0, c];  bias -> (1, 1, C_OUT)
    wq = jnp.transpose(weight.reshape(C_OUT, KH * KW)).reshape(KH * KW, 1, 1, C_OUT)
    bq = bias.reshape(1, 1, C_OUT)

    flops = 2 * N * H_out * W_out * KH * KW * C_OUT
    bytes_accessed = (
        xq.size * 4 + wq.size * 4 + bq.size * 4 + N * H_out * W_out * C_OUT * 4
    )

    out = pl.pallas_call(
        _make_conv_kernel(H_out, W_out),
        out_shape=jax.ShapeDtypeStruct((N, H_out, W_out, C_OUT), x.dtype),
        grid=(N,),
        in_specs=[
            # one image's space-to-depth block per grid step (batch dim squeezed)
            pl.BlockSpec((None, H2, W2, 4), lambda n: (n, 0, 0, 0)),
            # small resident weights / bias, same block every step
            pl.BlockSpec((KH * KW, 1, 1, C_OUT), lambda n: (0, 0, 0, 0)),
            pl.BlockSpec((1, 1, C_OUT), lambda n: (0, 0, 0)),
        ],
        out_specs=pl.BlockSpec((None, H_out, W_out, C_OUT), lambda n: (n, 0, 0, 0)),
        compiler_params=pltpu.CompilerParams(dimension_semantics=("parallel",)),
        cost_estimate=pl.CostEstimate(
            flops=flops, transcendentals=0, bytes_accessed=bytes_accessed
        ),
    )(xq, wq, bq)
    return out


if __name__ == "__main__":
    key = jax.random.PRNGKey(0)
    N, H, W = 2, 16, 16
    constant_init = 0.1  # torch.nn.init.constant_ on weight and bias

    x = jax.random.normal(key, (N, H, W, 1), dtype=jnp.float32)
    weight = jnp.full((C_OUT, 1, KH, KW), constant_init, dtype=jnp.float32)
    bias = jnp.full((C_OUT,), constant_init, dtype=jnp.float32)

    out = jax.block_until_ready(jax.jit(torch_conv_forward)(x, weight, bias))
    assert out.shape == (N, (H - KH) // STRIDE + 1, (W - KW) // STRIDE + 1, C_OUT)

    # Cross-check against XLA's conv (same NCHW / OIHW convention as PyTorch).
    x_nchw = jnp.transpose(x, (0, 3, 1, 2))
    ref = jax.lax.conv_general_dilated(x_nchw, weight, (STRIDE, STRIDE), "VALID")
    ref = jnp.transpose(ref, (0, 2, 3, 1)) + bias
    np.testing.assert_allclose(np.asarray(out), np.asarray(ref), rtol=1e-5, atol=1e-5)

    print("KERNEL_OK")
</pallas_src>

<mosaic_0001>
module attributes {stable_mosaic.version = 11 : i64} {
  func.func @kernel(%arg0: i32, %arg1: memref<1x8x8x4xf32, #tpu.memory_space<vmem>>, %arg2: memref<9x1x1x32xf32, #tpu.memory_space<vmem>>, %arg3: memref<1x1x32xf32, #tpu.memory_space<vmem>>, %arg4: memref<1x7x7x32xf32, #tpu.memory_space<vmem>>) attributes {dimension_semantics = [#tpu.dimension_semantics<parallel>], iteration_bounds = array<i64: 2>, scalar_prefetch = 0 : i64, scratch_operands = 0 : i64, tpu.core_type = #tpu.core_type<tc>, window_params = [{transform_indices = @transform_0, window_bounds = array<i64: 1, 8, 8, 4>}, {pipeline_mode = #tpu.pipeline_mode<synchronous>, transform_indices = @transform_1, window_bounds = array<i64: 9, 1, 1, 32>}, {pipeline_mode = #tpu.pipeline_mode<synchronous>, transform_indices = @transform_2, window_bounds = array<i64: 1, 1, 32>}, {transform_indices = @transform_3, window_bounds = array<i64: 1, 7, 7, 32>}]} {
    %cst = arith.constant 0.000000e+00 : f32
    %0 = vector.broadcast %cst : f32 to vector<7x7x32xf32>
    %c0 = arith.constant 0 : index
    %c0_0 = arith.constant 0 : index
    %c0_1 = arith.constant 0 : index
    %c0_2 = arith.constant 0 : index
    %1 = vector.load %arg1[%c0, %c0_0, %c0_1, %c0_2] : memref<1x8x8x4xf32, #tpu.memory_space<vmem>>, vector<1x7x7x1xf32>
    %2 = vector.shape_cast %1 : vector<1x7x7x1xf32> to vector<7x7x1xf32>
    %c0_3 = arith.constant 0 : index
    %c0_4 = arith.constant 0 : index
    %c0_5 = arith.constant 0 : index
    %c0_6 = arith.constant 0 : index
    %3 = vector.load %arg2[%c0_3, %c0_4, %c0_5, %c0_6] : memref<9x1x1x32xf32, #tpu.memory_space<vmem>>, vector<1x1x1x32xf32>
    %4 = vector.shape_cast %3 : vector<1x1x1x32xf32> to vector<1x1x32xf32>
    %5 = vector.broadcast %2 : vector<7x7x1xf32> to vector<7x7x32xf32>
    %6 = vector.broadcast %4 : vector<1x1x32xf32> to vector<7x7x32xf32>
    %7 = arith.mulf %5, %6 : vector<7x7x32xf32>
    %8 = arith.addf %0, %7 : vector<7x7x32xf32>
    %c0_7 = arith.constant 0 : index
    %c0_8 = arith.constant 0 : index
    %c0_9 = arith.constant 0 : index
    %c1 = arith.constant 1 : index
    %9 = vector.load %arg1[%c0_7, %c0_8, %c0_9, %c1] : memref<1x8x8x4xf32, #tpu.memory_space<vmem>>, vector<1x7x7x1xf32>
    %10 = vector.shape_cast %9 : vector<1x7x7x1xf32> to vector<7x7x1xf32>
    %c1_10 = arith.constant 1 : index
    %c0_11 = arith.constant 0 : index
    %c0_12 = arith.constant 0 : index
    %c0_13 = arith.constant 0 : index
    %11 = vector.load %arg2[%c1_10, %c0_11, %c0_12, %c0_13] : memref<9x1x1x32xf32, #tpu.memory_space<vmem>>, vector<1x1x1x32xf32>
    %12 = vector.shape_cast %11 : vector<1x1x1x32xf32> to vector<1x1x32xf32>
    %13 = vector.broadcast %10 : vector<7x7x1xf32> to vector<7x7x32xf32>
    %14 = vector.broadcast %12 : vector<1x1x32xf32> to vector<7x7x32xf32>
    %15 = arith.mulf %13, %14 : vector<7x7x32xf32>
    %16 = arith.addf %8, %15 : vector<7x7x32xf32>
    %c0_14 = arith.constant 0 : index
    %c0_15 = arith.constant 0 : index
    %c1_16 = arith.constant 1 : index
    %c0_17 = arith.constant 0 : index
    %17 = vector.load %arg1[%c0_14, %c0_15, %c1_16, %c0_17] : memref<1x8x8x4xf32, #tpu.memory_space<vmem>>, vector<1x7x7x1xf32>
    %18 = vector.shape_cast %17 : vector<1x7x7x1xf32> to vector<7x7x1xf32>
    %c2 = arith.constant 2 : index
    %c0_18 = arith.constant 0 : index
    %c0_19 = arith.constant 0 : index
    %c0_20 = arith.constant 0 : index
    %19 = vector.load %arg2[%c2, %c0_18, %c0_19, %c0_20] : memref<9x1x1x32xf32, #tpu.memory_space<vmem>>, vector<1x1x1x32xf32>
    %20 = vector.shape_cast %19 : vector<1x1x1x32xf32> to vector<1x1x32xf32>
    %21 = vector.broadcast %18 : vector<7x7x1xf32> to vector<7x7x32xf32>
    %22 = vector.broadcast %20 : vector<1x1x32xf32> to vector<7x7x32xf32>
    %23 = arith.mulf %21, %22 : vector<7x7x32xf32>
    %24 = arith.addf %16, %23 : vector<7x7x32xf32>
    %c0_21 = arith.constant 0 : index
    %c0_22 = arith.constant 0 : index
    %c0_23 = arith.constant 0 : index
    %c2_24 = arith.constant 2 : index
    %25 = vector.load %arg1[%c0_21, %c0_22, %c0_23, %c2_24] : memref<1x8x8x4xf32, #tpu.memory_space<vmem>>, vector<1x7x7x1xf32>
    %26 = vector.shape_cast %25 : vector<1x7x7x1xf32> to vector<7x7x1xf32>
    %c3 = arith.constant 3 : index
    %c0_25 = arith.constant 0 : index
    %c0_26 = arith.constant 0 : index
    %c0_27 = arith.constant 0 : index
    %27 = vector.load %arg2[%c3, %c0_25, %c0_26, %c0_27] : memref<9x1x1x32xf32, #tpu.memory_space<vmem>>, vector<1x1x1x32xf32>
    %28 = vector.shape_cast %27 : vector<1x1x1x32xf32> to vector<1x1x32xf32>
    %29 = vector.broadcast %26 : vector<7x7x1xf32> to vector<7x7x32xf32>
    %30 = vector.broadcast %28 : vector<1x1x32xf32> to vector<7x7x32xf32>
    %31 = arith.mulf %29, %30 : vector<7x7x32xf32>
    %32 = arith.addf %24, %31 : vector<7x7x32xf32>
    %c0_28 = arith.constant 0 : index
    %c0_29 = arith.constant 0 : index
    %c0_30 = arith.constant 0 : index
    %c3_31 = arith.constant 3 : index
    %33 = vector.load %arg1[%c0_28, %c0_29, %c0_30, %c3_31] : memref<1x8x8x4xf32, #tpu.memory_space<vmem>>, vector<1x7x7x1xf32>
    %34 = vector.shape_cast %33 : vector<1x7x7x1xf32> to vector<7x7x1xf32>
    %c4 = arith.constant 4 : index
    %c0_32 = arith.constant 0 : index
    %c0_33 = arith.constant 0 : index
    %c0_34 = arith.constant 0 : index
    %35 = vector.load %arg2[%c4, %c0_32, %c0_33, %c0_34] : memref<9x1x1x32xf32, #tpu.memory_space<vmem>>, vector<1x1x1x32xf32>
    %36 = vector.shape_cast %35 : vector<1x1x1x32xf32> to vector<1x1x32xf32>
    %37 = vector.broadcast %34 : vector<7x7x1xf32> to vector<7x7x32xf32>
    %38 = vector.broadcast %36 : vector<1x1x32xf32> to vector<7x7x32xf32>
    %39 = arith.mulf %37, %38 : vector<7x7x32xf32>
    %40 = arith.addf %32, %39 : vector<7x7x32xf32>
    %c0_35 = arith.constant 0 : index
    %c0_36 = arith.constant 0 : index
    %c1_37 = arith.constant 1 : index
    %c2_38 = arith.constant 2 : index
    %41 = vector.load %arg1[%c0_35, %c0_36, %c1_37, %c2_38] : memref<1x8x8x4xf32, #tpu.memory_space<vmem>>, vector<1x7x7x1xf32>
    %42 = vector.shape_cast %41 : vector<1x7x7x1xf32> to vector<7x7x1xf32>
    %c5 = arith.constant 5 : index
    %c0_39 = arith.constant 0 : index
    %c0_40 = arith.constant 0 : index
    %c0_41 = arith.constant 0 : index
    %43 = vector.load %arg2[%c5, %c0_39, %c0_40, %c0_41] : memref<9x1x1x32xf32, #tpu.memory_space<vmem>>, vector<1x1x1x32xf32>
    %44 = vector.shape_cast %43 : vector<1x1x1x32xf32> to vector<1x1x32xf32>
    %45 = vector.broadcast %42 : vector<7x7x1xf32> to vector<7x7x32xf32>
    %46 = vector.broadcast %44 : vector<1x1x32xf32> to vector<7x7x32xf32>
    %47 = arith.mulf %45, %46 : vector<7x7x32xf32>
    %48 = arith.addf %40, %47 : vector<7x7x32xf32>
    %c0_42 = arith.constant 0 : index
    %c1_43 = arith.constant 1 : index
    %c0_44 = arith.constant 0 : index
    %c0_45 = arith.constant 0 : index
    %49 = vector.load %arg1[%c0_42, %c1_43, %c0_44, %c0_45] : memref<1x8x8x4xf32, #tpu.memory_space<vmem>>, vector<1x7x7x1xf32>
    %50 = vector.shape_cast %49 : vector<1x7x7x1xf32> to vector<7x7x1xf32>
    %c6 = arith.constant 6 : index
    %c0_46 = arith.constant 0 : index
    %c0_47 = arith.constant 0 : index
    %c0_48 = arith.constant 0 : index
    %51 = vector.load %arg2[%c6, %c0_46, %c0_47, %c0_48] : memref<9x1x1x32xf32, #tpu.memory_space<vmem>>, vector<1x1x1x32xf32>
    %52 = vector.shape_cast %51 : vector<1x1x1x32xf32> to vector<1x1x32xf32>
    %53 = vector.broadcast %50 : vector<7x7x1xf32> to vector<7x7x32xf32>
    %54 = vector.broadcast %52 : vector<1x1x32xf32> to vector<7x7x32xf32>
    %55 = arith.mulf %53, %54 : vector<7x7x32xf32>
    %56 = arith.addf %48, %55 : vector<7x7x32xf32>
    %c0_49 = arith.constant 0 : index
    %c1_50 = arith.constant 1 : index
    %c0_51 = arith.constant 0 : index
    %c1_52 = arith.constant 1 : index
    %57 = vector.load %arg1[%c0_49, %c1_50, %c0_51, %c1_52] : memref<1x8x8x4xf32, #tpu.memory_space<vmem>>, vector<1x7x7x1xf32>
    %58 = vector.shape_cast %57 : vector<1x7x7x1xf32> to vector<7x7x1xf32>
    %c7 = arith.constant 7 : index
    %c0_53 = arith.constant 0 : index
    %c0_54 = arith.constant 0 : index
    %c0_55 = arith.constant 0 : index
    %59 = vector.load %arg2[%c7, %c0_53, %c0_54, %c0_55] : memref<9x1x1x32xf32, #tpu.memory_space<vmem>>, vector<1x1x1x32xf32>
    %60 = vector.shape_cast %59 : vector<1x1x1x32xf32> to vector<1x1x32xf32>
    %61 = vector.broadcast %58 : vector<7x7x1xf32> to vector<7x7x32xf32>
    %62 = vector.broadcast %60 : vector<1x1x32xf32> to vector<7x7x32xf32>
    %63 = arith.mulf %61, %62 : vector<7x7x32xf32>
    %64 = arith.addf %56, %63 : vector<7x7x32xf32>
    %c0_56 = arith.constant 0 : index
    %c1_57 = arith.constant 1 : index
    %c1_58 = arith.constant 1 : index
    %c0_59 = arith.constant 0 : index
    %65 = vector.load %arg1[%c0_56, %c1_57, %c1_58, %c0_59] : memref<1x8x8x4xf32, #tpu.memory_space<vmem>>, vector<1x7x7x1xf32>
    %66 = vector.shape_cast %65 : vector<1x7x7x1xf32> to vector<7x7x1xf32>
    %c8 = arith.constant 8 : index
    %c0_60 = arith.constant 0 : index
    %c0_61 = arith.constant 0 : index
    %c0_62 = arith.constant 0 : index
    %67 = vector.load %arg2[%c8, %c0_60, %c0_61, %c0_62] : memref<9x1x1x32xf32, #tpu.memory_space<vmem>>, vector<1x1x1x32xf32>
    %68 = vector.shape_cast %67 : vector<1x1x1x32xf32> to vector<1x1x32xf32>
    %69 = vector.broadcast %66 : vector<7x7x1xf32> to vector<7x7x32xf32>
    %70 = vector.broadcast %68 : vector<1x1x32xf32> to vector<7x7x32xf32>
    %71 = arith.mulf %69, %70 : vector<7x7x32xf32>
    %72 = arith.addf %64, %71 : vector<7x7x32xf32>
    %c0_63 = arith.constant 0 : index
    %c0_64 = arith.constant 0 : index
    %c0_65 = arith.constant 0 : index
    %73 = vector.load %arg3[%c0_63, %c0_64, %c0_65] : memref<1x1x32xf32, #tpu.memory_space<vmem>>, vector<1x1x32xf32>
    %74 = vector.broadcast %73 : vector<1x1x32xf32> to vector<7x7x32xf32>
    %75 = arith.addf %72, %74 : vector<7x7x32xf32>
    %c0_66 = arith.constant 0 : index
    %c0_67 = arith.constant 0 : index
    %c0_68 = arith.constant 0 : index
    %c0_69 = arith.constant 0 : index
    %76 = vector.load %arg4[%c0_66, %c0_67, %c0_68, %c0_69] : memref<1x7x7x32xf32, #tpu.memory_space<vmem>>, vector<1x7x7x32xf32>
    %77 = vector.shape_cast %76 : vector<1x7x7x32xf32> to vector<7x7x32xf32>
    %78 = vector.shape_cast %75 : vector<7x7x32xf32> to vector<1x7x7x32xf32>
    tpu.vector_store %arg4[%c0_66, %c0_67, %c0_68, %c0_69], %78 {strides = array<i32>} : memref<1x7x7x32xf32, #tpu.memory_space<vmem>>, vector<1x7x7x32xf32>,
    return
  }
  func.func @transform_0(%arg0: i32) -> (i32, i32, i32, i32) {
    %c0_i32 = arith.constant 0 : i32
    %c0_i32_0 = arith.constant 0 : i32
    %c0_i32_1 = arith.constant 0 : i32
    %c0_i32_2 = arith.constant 0 : i32
    return %arg0, %c0_i32, %c0_i32_0, %c0_i32_1 : i32, i32, i32, i32
  }
  func.func @transform_1(%arg0: i32) -> (i32, i32, i32, i32) {
    %c0_i32 = arith.constant 0 : i32
    %c0_i32_0 = arith.constant 0 : i32
    %c0_i32_1 = arith.constant 0 : i32
    %c0_i32_2 = arith.constant 0 : i32
    %c0_i32_3 = arith.constant 0 : i32
    return %c0_i32, %c0_i32_0, %c0_i32_1, %c0_i32_2 : i32, i32, i32, i32
  }
  func.func @transform_2(%arg0: i32) -> (i32, i32, i32) {
    %c0_i32 = arith.constant 0 : i32
    %c0_i32_0 = arith.constant 0 : i32
    %c0_i32_1 = arith.constant 0 : i32
    %c0_i32_2 = arith.constant 0 : i32
    return %c0_i32, %c0_i32_0, %c0_i32_1 : i32, i32, i32
  }
  func.func @transform_3(%arg0: i32) -> (i32, i32, i32, i32) {
    %c0_i32 = arith.constant 0 : i32
    %c0_i32_0 = arith.constant 0 : i32
    %c0_i32_1 = arith.constant 0 : i32
    %c0_i32_2 = arith.constant 0 : i32
    return %arg0, %c0_i32, %c0_i32_0, %c0_i32_1 : i32, i32, i32, i32
  }
}

</mosaic_0001>

<bundles_post_ra>
// kernel: torch_conv_forward.1
= control target key start
LH: loop header
LB: loop body
LE: loop exit
PB: predicated region body
PF: predicated region fallthrough
CT: control target
= control target key end

     0   :  { %s855_s12 = smov 0   ;;  %s1113_s0 = inlined_call_operand.vmem [shape: f32[2,8,8,4], index: 0, kind: input, shape index: {}]   ;;  %s1114_s1 = inlined_call_operand.vmem [shape: f32[9,1,1,32], index: 1, kind: input, shape index: {}]   ;;  %s1115_s2 = inlined_call_operand.vmem [shape: f32[1,1,32], index: 2, kind: input, shape index: {}]   ;;  %s1116_s3 = inlined_call_operand.vmem [shape: f32[2,7,7,32], index: 3, kind: output, shape index: {}]  }
   0x1 LB: > { %s754_s13 = sadd.s32 4294967295, %s829_s12   ;;  %p758_p0 = scmp.ge.s32.totalorder %s829_s12, 1  ;;  %s829_s12 = sphi %s855_s12, %s13_s12  }
   0x2   : > { %p137_p1 = scmp.lt.s32.totalorder %s829_s12, 3 }
   0x4   : > { %p138_p2 = pnand %p758_p0, %p137_p1 }
   0x5   : > { %p161_p3 = scmp.lt.s32.totalorder (!%p138_p2), %s754_s13, 1 }
   0x6   : > { %141 = sbr.rel (%p138_p2) target bundleno = 290 (0x122), region = 32 }
   0xb   : > { %v831_v0 = vmov 3   ;;  %v832_v1 = vmov 0   ;;  %s1118_s13 = smov (!%p161_p3, %s754_s13), 1  ;;  %v833_v9 = vmov 1   ;;  %v834_v10 = vmov 2  }
   0xc   : > { %815 = vset.pattern.permute.xlu0 %v831_v0  ;;  %810 = vset.pattern.permute.xlu1 %v832_v1  ;;  %s796_s14 = sshll.u32 %s1118_s13, 6  ;;  %v917_v39 = vld [vmem:[%s1114_s1] ss:$0 sm:$0xff]  ;;  %v922_v40 = vld [vmem:[%s1114_s1 + $0x1] ss:$0 sm:$0xff]  ;;  %s797_s9 = smul.u32 56, %s1118_s13 }
   0xd   : > { %s870_s17 = scalar_lea.vmem %s1113_s0, %s796_s14  ;;  %v944_v60 = vld [vmem:[%s1114_s1 + $0x2] ss:$0 sm:$0xff]  ;;  %vm691_vm0 = vcmask 260096  }
   0xe   : > { %v173_v2 = vld [vmem:[%s870_s17 + $0x10] sm:$0x7f]  ;;  %v172_v3 = vld [vmem:[%s870_s17 + $0x8] sm:$0x7f]  ;;  %v174_v4 = vld [vmem:[%s870_s17 + $0x18] sm:$0x7f]  ;;  %s1051_s13 = scalar_lea.vmem %s1116_s3, %s797_s9 }
   0xf   : > { %191 = vperm.xlu1 %810, %v173_v2   ;;  %405 = vperm.xlu0 %815, %v172_v3   ;;  %v175_v5 = vld [vmem:[%s870_s17 + $0x20] sm:$0x7f]  ;;  %v176_v6 = vld [vmem:[%s870_s17 + $0x28] sm:$0x7f]  ;;  %v177_v7 = vld [vmem:[%s870_s17 + $0x30] sm:$0x7f] }
  0x10   : > { %v171_v8 = vld [vmem:[%s870_s17] sm:$0x7f]  ;;  %v285_v11 = vld [vmem:[%s870_s17 + $0x9] sm:$0x7f]  ;;  %v290_v14 = vld [vmem:[%s870_s17 + $0x31] sm:$0x7f] }
  0x11   : > { %v288_v12 = vld [vmem:[%s870_s17 + $0x21] sm:$0x7f]  ;;  %v286_v15 = vld [vmem:[%s870_s17 + $0x11] sm:$0x7f]  ;;  %v287_v16 = vld [vmem:[%s870_s17 + $0x19] sm:$0x7f] }
  0x12   : > { %v284_v13 = vld [vmem:[%s870_s17 + $0x1] sm:$0x7f]  ;;  %v289_v17 = vld [vmem:[%s870_s17 + $0x29] sm:$0x7f]  ;;  %v774_v18 = vld [vmem:[%s870_s17 + $0x10] sm:$0x7f] }
  0x13   : > { %196 = vperm.xlu1 %810, %v174_v4   ;;  %417 = vperm.xlu0 %815, %v175_v5   ;;  %v777_v19 = vld [vmem:[%s870_s17 + $0x28] sm:$0x7f]  ;;  %v779_v20 = vld [vmem:[%s870_s17 + $0x38] sm:$0x7f]  ;;  %v785_v23 = vld [vmem:[%s870_s17 + $0x11] sm:$0x7f] }
  0x14   : > { %v773_v21 = vld [vmem:[%s870_s17 + $0x8] sm:$0x7f]  ;;  %v775_v22 = vld [vmem:[%s870_s17 + $0x18] sm:$0x7f]  ;;  %v776_v24 = vld [vmem:[%s870_s17 + $0x20] sm:$0x7f] }
  0x15   : > { %v788_v25 = vld [vmem:[%s870_s17 + $0x29] sm:$0x7f]  ;;  %v778_v26 = vld [vmem:[%s870_s17 + $0x30] sm:$0x7f]  ;;  %v790_v27 = vld [vmem:[%s870_s17 + $0x39] sm:$0x7f] }
  0x16   : > { %v784_v32 = vld [vmem:[%s870_s17 + $0x9] sm:$0x7f]  ;;  %v786_v35 = vld [vmem:[%s870_s17 + $0x19] sm:$0x7f]  ;;  %v787_v38 = vld [vmem:[%s870_s17 + $0x21] sm:$0x7f] }
  0x17   : > { %206 = vperm.xlu1 %810, %v176_v6   ;;  %425 = vperm.xlu0 %815, %v177_v7   ;;  %v789_v45 = vld [vmem:[%s870_s17 + $0x31] sm:$0x7f] }
  0x1b   : > { %811 = vset.pattern.permute.xlu1 %v833_v9  ;;  %816 = vset.pattern.permute.xlu0 %v834_v10 }
  0x1c   : > { %355 = vperm.xlu0 %816, %v172_v3   ;;  %237 = vperm.xlu1 %811, %v171_v8  }
  0x20   : > { %367 = vperm.xlu0 %816, %v175_v5   ;;  %245 = vperm.xlu1 %811, %v173_v2  }
  0x24   : > { %375 = vperm.xlu0 %816, %v177_v7   ;;  %249 = vperm.xlu1 %811, %v174_v4  }
  0x28   : > { %455 = vperm.xlu0 %816, %v285_v11   ;;  %257 = vperm.xlu1 %811, %v176_v6  }
  0x2c   : > { %467 = vperm.xlu0 %816, %v288_v12   ;;  %812 = vset.pattern.permute.xlu1 %v832_v1 }
  0x2d   : > { %295 = vperm.xlu1 %812, %v284_v13  }
  0x30   : > { %475 = vperm.xlu0 %816, %v290_v14  }
  0x31   : > { %305 = vperm.xlu1 %812, %v286_v15  }
  0x34   : > { %818 = vset.pattern.permute.xlu0 %v833_v9 }
  0x35   : > { %241 = vperm.xlu0 %818, %v172_v3   ;;  %310 = vperm.xlu1 %812, %v287_v16  }
  0x39   : > { %253 = vperm.xlu0 %818, %v175_v5   ;;  %320 = vperm.xlu1 %812, %v289_v17  }
  0x3d   : > { %261 = vperm.xlu0 %818, %v177_v7   ;;  %813 = vset.pattern.permute.xlu1 %v834_v10 }
  0x3e   : > { %351 = vperm.xlu1 %813, %v171_v8  }
  0x41   : > { %570 = vperm.xlu0 %818, %v774_v18  }
  0x42   : > { %359 = vperm.xlu1 %813, %v173_v2  }
  0x45   : > { %582 = vperm.xlu0 %818, %v777_v19  }
  0x46   : > { %363 = vperm.xlu1 %813, %v174_v4  }
  0x49   : > { %590 = vperm.xlu0 %818, %v779_v20  }
  0x4a   : > { %371 = vperm.xlu1 %813, %v176_v6  }
  0x4d   : > { %821 = vset.pattern.permute.xlu0 %v832_v1 }
  0x4e   : > { %181 = vperm.xlu0 %821, %v171_v8   ;;  %814 = vset.pattern.permute.xlu1 %v831_v0 }
  0x4f   : > { %401 = vperm.xlu1 %814, %v171_v8  }
  0x52   : > { %186 = vperm.xlu0 %821, %v172_v3  }
  0x53   : > { %409 = vperm.xlu1 %814, %v173_v2  }
  0x56   : > { %201 = vperm.xlu0 %821, %v175_v5  }
  0x57   : > { %413 = vperm.xlu1 %814, %v174_v4  }
  0x5a   : > { %211 = vperm.xlu0 %821, %v177_v7  }
  0x5b   : > { %421 = vperm.xlu1 %814, %v176_v6  }
  0x5e   : > { %300 = vperm.xlu0 %821, %v285_v11   ;;  %v768_v11 = vld [vmem:[%s1114_s1 + $0x3] ss:$0 sm:$0xff] }
  0x5f   : > { %817 = vset.pattern.permute.xlu1 %v834_v10 }
  0x60   : > { %451 = vperm.xlu1 %817, %v284_v13  }
  0x62   : > { %315 = vperm.xlu0 %821, %v288_v12  }
  0x64   : > { %459 = vperm.xlu1 %817, %v286_v15  }
  0x66   : > { %325 = vperm.xlu0 %821, %v290_v14  }
  0x68   : > { %463 = vperm.xlu1 %817, %v287_v16  }
  0x6a   : > { %515 = vperm.xlu0 %821, %v774_v18  }
  0x6c   : > { %471 = vperm.xlu1 %817, %v289_v17  }
  0x6e   : > { %530 = vperm.xlu0 %821, %v777_v19  }
  0x70   : > { %819 = vset.pattern.permute.xlu1 %v832_v1 }
  0x71   : > { %510 = vperm.xlu1 %819, %v773_v21  }
  0x72   : > { %540 = vperm.xlu0 %821, %v779_v20  }
  0x75   : > { %520 = vperm.xlu1 %819, %v775_v22  }
  0x76   : > { %629 = vperm.xlu0 %821, %v785_v23  }
  0x79   : > { %525 = vperm.xlu1 %819, %v776_v24  }
  0x7a   : > { %644 = vperm.xlu0 %821, %v788_v25  }
  0x7d   : > { %535 = vperm.xlu1 %819, %v778_v26  }
  0x7e   : > { %654 = vperm.xlu0 %821, %v790_v27  }
  0x81   : > { %820 = vset.pattern.permute.xlu1 %v833_v9 }
  0x82   : > { %566 = vperm.xlu1 %820, %v773_v21  }
  0x86   : > { %574 = vperm.xlu1 %820, %v775_v22  }
  0x8a   : > { %v192_v28 = vpop.permute.xlu1 %191  ;;  %578 = vperm.xlu1 %820, %v776_v24   ;;  %v902_v29 = vpop.permute.xlu0 %405 }
  0x8b   : > { %v222_v43 = vmul.f32 %v917_v39, %v192_v28 }
  0x8e   : > { %v197_v30 = vpop.permute.xlu1 %196  ;;  %586 = vperm.xlu1 %820, %v778_v26   ;;  %v904_v31 = vpop.permute.xlu0 %417 }
  0x8f   : > { %v223_v49 = vmul.f32 %v917_v39, %v197_v30 }
  0x92   : > { %v207_v33 = vpop.permute.xlu1 %206  ;;  %822 = vset.pattern.permute.xlu1 %v832_v1  ;;  %v908_v34 = vpop.permute.xlu0 %425 }
  0x93   : > { %624 = vperm.xlu1 %822, %v784_v32   ;;  %v225_v54 = vmul.f32 %v917_v39, %v207_v33 }
  0x97   : > { %634 = vperm.xlu1 %822, %v786_v35   ;;  %v238_v36 = vpop.permute.xlu1 %237  ;;  %v911_v37 = vpop.permute.xlu0 %355 }
  0x98   : > { %v270_v24 = vmul.f32 %v922_v40, %v238_v36 }
  0x9b   : > { %639 = vperm.xlu1 %822, %v787_v38   ;;  %v246_v41 = vpop.permute.xlu1 %245  ;;  %v924_v42 = vpop.permute.xlu0 %367 }
  0x9c   : > { %v272_v44 = vmul.f32 %v922_v40, %v246_v41 }
  0x9e   : > { %v279_v46 = vadd.f32 %v272_v44, %v222_v43 }
  0x9f   : > { %649 = vperm.xlu1 %822, %v789_v45   ;;  %v250_v47 = vpop.permute.xlu1 %249  ;;  %v929_v48 = vpop.permute.xlu0 %375 }
  0xa0   : > { %v273_v50 = vmul.f32 %v922_v40, %v250_v47 }
  0xa2   : > { %v280_v51 = vadd.f32 %v273_v50, %v223_v49  ;;  %v982_v49 = vld [vmem:[%s1114_s1 + $0x4] ss:$0 sm:$0xff] }
  0xa3   : > { %v258_v52 = vpop.permute.xlu1 %257  ;;  %v933_v53 = vpop.permute.xlu0 %455 }
  0xa4   : > { %v275_v55 = vmul.f32 %v922_v40, %v258_v52 }
  0xa6   : > { %v282_v56 = vadd.f32 %v275_v55, %v225_v54 }
  0xa7   : > { %v937_v57 = vpop.permute.xlu0 %467 }
  0xa8   : > { %v296_v58 = vpop.permute.xlu1 %295 }
  0xa9   : > { %v334_v27 = vmul.f32 %v944_v60, %v296_v58 }
  0xab   : > { %v939_v59 = vpop.permute.xlu0 %475 }
  0xac   : > { %v306_v61 = vpop.permute.xlu1 %305 }
  0xad   : > { %v336_v62 = vmul.f32 %v944_v60, %v306_v61  ;;  %v435_v61 = vmul.f32 %v982_v49, %v902_v29 }
  0xaf   : > { %v343_v63 = vadd.f32 %v336_v62, %v279_v46  ;;  %v995_v62 = vld [vmem:[%s1114_s1 + $0x5] ss:$0 sm:$0xff] }
  0xb0   : > { %v311_v0 = vpop.permute.xlu1 %310  ;;  %v242_v1 = vpop.permute.xlu0 %241 }
  0xb1   : > { %v337_v2 = vmul.f32 %v944_v60, %v311_v0  ;;  %v271_v36 = vmul.f32 %v922_v40, %v242_v1 }
  0xb3   : > { %v344_v3 = vadd.f32 %v337_v2, %v280_v51 }
  0xb4   : > { %v321_v4 = vpop.permute.xlu1 %320  ;;  %v254_v5 = vpop.permute.xlu0 %253 }
  0xb5   : > { %v339_v6 = vmul.f32 %v944_v60, %v321_v4  ;;  %v274_v50 = vmul.f32 %v922_v40, %v254_v5  ;;  %v388_v4 = vmul.f32 %v768_v11, %v924_v42  ;;  %v390_v42 = vmul.f32 %v768_v11, %v929_v48 }
  0xb6   : > { %v490_v48 = vmul.f32 %v995_v62, %v939_v59 }
  0xb7   : > { %v346_v7 = vadd.f32 %v339_v6, %v282_v56  ;;  %v385_v56 = vmul.f32 %v768_v11, %v911_v37  ;;  %v485_v37 = vmul.f32 %v995_v62, %v933_v53  ;;  %v488_v53 = vmul.f32 %v995_v62, %v937_v57 }
  0xb8   : > { %v262_v8 = vpop.permute.xlu0 %261 }
  0xb9   : > { %v352_v9 = vpop.permute.xlu1 %351  ;;  %v276_v29 = vmul.f32 %v922_v40, %v262_v8 }
  0xba   : > { %v384_v32 = vmul.f32 %v768_v11, %v352_v9  ;;  %v438_v9 = vmul.f32 %v982_v49, %v904_v31 }
  0xbc   : > { %v949_v10 = vpop.permute.xlu0 %570 }
  0xbd   : > { %v360_v12 = vpop.permute.xlu1 %359 }
  0xbe   : > { %v386_v13 = vmul.f32 %v768_v11, %v360_v12 }
  0xc0   : > { %v954_v14 = vadd.f32 %v386_v13, %v343_v63  ;;  %v956_v15 = vpop.permute.xlu0 %582 }
  0xc1   : > { %v364_v16 = vpop.permute.xlu1 %363 }
  0xc2   : > { %v387_v17 = vmul.f32 %v768_v11, %v364_v16 }
  0xc4   : > { %v958_v18 = vadd.f32 %v387_v17, %v344_v3  ;;  %v960_v19 = vpop.permute.xlu0 %590 }
  0xc5   : > { %v372_v20 = vpop.permute.xlu1 %371 }
  0xc6   : > { %v389_v21 = vmul.f32 %v768_v11, %v372_v20 }
  0xc8   : > { %v962_v22 = vadd.f32 %v389_v21, %v346_v7 }
  0xc9   : > { %v182_v23 = vpop.permute.xlu0 %181 }
  0xca   : > { %v220_v25 = vmul.f32 %v917_v39, %v182_v23  ;;  %v966_v26 = vpop.permute.xlu1 %401  ;;  %v440_v23 = vmul.f32 %v982_v49, %v908_v34  ;;  %v1028_v34 = vld [vmem:[%s1114_s1 + $0x7] ss:$0 sm:$0xff] }
  0xcb   : > { %v600_v59 = vmul.f32 %v1028_v34, %v949_v10 }
  0xcc   : > { %v277_v28 = vadd.f32 %v270_v24, %v220_v25 }
  0xcd   : > { %v187_v30 = vpop.permute.xlu0 %186 }
  0xce   : > { %v341_v33 = vadd.f32 %v334_v27, %v277_v28  ;;  %v969_v35 = vpop.permute.xlu1 %409  ;;  %v221_v45 = vmul.f32 %v917_v39, %v187_v30 }
  0xd0   : > { %v971_v38 = vadd.f32 %v384_v32, %v341_v33  ;;  %v278_v51 = vadd.f32 %v271_v36, %v221_v45 }
  0xd1   : > { %v202_v41 = vpop.permute.xlu0 %201 }
  0xd2   : > { %v973_v43 = vpop.permute.xlu1 %413  ;;  %v224_v52 = vmul.f32 %v917_v39, %v202_v41 }
  0xd4   : > { %v281_v0 = vadd.f32 %v274_v50, %v224_v52 }
  0xd5   : > { %v212_v44 = vpop.permute.xlu0 %211 }
  0xd6   : > { %v977_v46 = vpop.permute.xlu1 %421  ;;  %v226_v1 = vmul.f32 %v917_v39, %v212_v44  ;;  %v1034_v44 = vld [vmem:[%s1114_s1 + $0x8] ss:$0 sm:$0xff] }
  0xd8   : > { %v283_v13 = vadd.f32 %v276_v29, %v226_v1 }
  0xd9   : > { %v301_v47 = vpop.permute.xlu0 %300 }
  0xda   : > { %v335_v54 = vmul.f32 %v944_v60, %v301_v47 }
  0xdb   : > { %v987_v55 = vpop.permute.xlu1 %451 }
  0xdc   : > { %v342_v58 = vadd.f32 %v335_v54, %v278_v51  ;;  %v1044_v54 = vld [vmem:[%s1115_s2] ss:$0 sm:$0xff] }
  0xdd   : > { %v316_v63 = vpop.permute.xlu0 %315 }
  0xde   : > { %v392_v2 = vadd.f32 %v385_v56, %v342_v58  ;;  %v338_v3 = vmul.f32 %v944_v60, %v316_v63  ;;  %v603_v56 = vmul.f32 %v1028_v34, %v956_v15  ;;  %v605_v15 = vmul.f32 %v1028_v34, %v960_v19 }
  0xdf   : > { %v1000_v5 = vpop.permute.xlu1 %459 }
  0xe0   : > { %v345_v6 = vadd.f32 %v338_v3, %v281_v0  ;;  %v442_v7 = vadd.f32 %v435_v61, %v392_v2 }
  0xe1   : > { %v326_v12 = vpop.permute.xlu0 %325 }
  0xe2   : > { %v395_v39 = vadd.f32 %v388_v4, %v345_v6  ;;  %v340_v16 = vmul.f32 %v944_v60, %v326_v12  ;;  %v492_v17 = vadd.f32 %v485_v37, %v442_v7  ;;  %v1018_v60 = vld [vmem:[%s1114_s1 + $0x6] ss:$0 sm:$0xff] }
  0xe3   : > { %v1008_v20 = vpop.permute.xlu1 %463 }
  0xe4   : > { %v347_v21 = vadd.f32 %v340_v16, %v283_v13  ;;  %v445_v40 = vadd.f32 %v438_v9, %v395_v39  ;;  %v434_v16 = vmul.f32 %v982_v49, %v966_v26  ;;  %v437_v26 = vmul.f32 %v982_v49, %v973_v43 }
  0xe5   : > { %v516_v8 = vpop.permute.xlu0 %515  ;;  %v439_v43 = vmul.f32 %v982_v49, %v977_v46 }
  0xe6   : > { %v397_v31 = vadd.f32 %v390_v42, %v347_v21  ;;  %v495_v24 = vadd.f32 %v488_v53, %v445_v40  ;;  %v550_v27 = vmul.f32 %v1018_v60, %v516_v8  ;;  %v441_v42 = vadd.f32 %v434_v16, %v971_v38 }
  0xe7   : > { %v1020_v25 = vpop.permute.xlu1 %471  ;;  %v436_v53 = vmul.f32 %v982_v49, %v969_v35  ;;  %v487_v35 = vmul.f32 %v995_v62, %v1008_v20 }
  0xe8   : > { %v447_v57 = vadd.f32 %v440_v23, %v397_v31  ;;  %v557_v33 = vadd.f32 %v550_v27, %v492_v17  ;;  %v484_v17 = vmul.f32 %v995_v62, %v987_v55  ;;  %v486_v23 = vmul.f32 %v995_v62, %v1000_v5 }
  0xe9   : > { %v531_v11 = vpop.permute.xlu0 %530  ;;  %v489_v20 = vmul.f32 %v995_v62, %v1020_v25 }
  0xea   : > { %v497_v28 = vadd.f32 %v490_v48, %v447_v57  ;;  %v553_v41 = vmul.f32 %v1018_v60, %v531_v11  ;;  %v607_v51 = vadd.f32 %v600_v59, %v557_v33  ;;  %v491_v8 = vadd.f32 %v484_v17, %v441_v42 }
  0xec   : > { %v511_v30 = vpop.permute.xlu1 %510  ;;  %v560_v47 = vadd.f32 %v553_v41, %v495_v24  ;;  %v443_v24 = vadd.f32 %v436_v53, %v954_v14 }
  0xed   : > { %v541_v32 = vpop.permute.xlu0 %540  ;;  %v549_v21 = vmul.f32 %v1018_v60, %v511_v30 }
  0xee   : > { %v555_v50 = vmul.f32 %v1018_v60, %v541_v32  ;;  %v610_v1 = vadd.f32 %v603_v56, %v560_v47  ;;  %v493_v57 = vadd.f32 %v486_v23, %v443_v24  ;;  %v446_v47 = vadd.f32 %v439_v43, %v962_v22 }
  0xef   : > { %v556_v55 = vadd.f32 %v549_v21, %v491_v8 }
  0xf0   : > { %v521_v36 = vpop.permute.xlu1 %520  ;;  %v562_v63 = vadd.f32 %v555_v50, %v497_v28  ;;  %v444_v28 = vadd.f32 %v437_v26, %v958_v18 }
  0xf1   : > { %v630_v45 = vpop.permute.xlu0 %629  ;;  %v551_v38 = vmul.f32 %v1018_v60, %v521_v36 }
  0xf2   : > { %v664_v52 = vmul.f32 %v1034_v44, %v630_v45  ;;  %v612_v6 = vadd.f32 %v605_v15, %v562_v63  ;;  %v494_v33 = vadd.f32 %v487_v35, %v444_v28 }
  0xf3   : > { %v558_v14 = vadd.f32 %v551_v38, %v493_v57 }
  0xf4   : > { %v671_v58 = vadd.f32 %v664_v52, %v607_v51  ;;  %v526_v61 = vpop.permute.xlu1 %525  ;;  %v496_v51 = vadd.f32 %v489_v20, %v446_v47 }
  0xf5   : > { %v645_v10 = vpop.permute.xlu0 %644  ;;  %v552_v30 = vmul.f32 %v1018_v60, %v526_v61 }
  0xf6   : > { %v685_v0 = vadd.f32 %v1044_v54, %v671_v58  ;;  %v667_v2 = vmul.f32 %v1034_v44, %v645_v10 }
  0xf7   : > { %v559_v46 = vadd.f32 %v552_v30, %v494_v33 }
  0xf8   : > { %693 = vst.msk [vmem:[%s1051_s13 + $0x8] sm:$0x7f] %vm691_vm0, %v685_v0  ;;  %v674_v3 = vadd.f32 %v667_v2, %v610_v1  ;;  %v536_v4 = vpop.permute.xlu1 %535 }
  0xf9   : > { %v655_v37 = vpop.permute.xlu0 %654  ;;  %v554_v49 = vmul.f32 %v1018_v60, %v536_v4 }
  0xfa   : > { %v688_v29 = vadd.f32 %v1044_v54, %v674_v3  ;;  %v669_v7 = vmul.f32 %v1034_v44, %v655_v37 }
  0xfb   : > { %v561_v61 = vadd.f32 %v554_v49, %v496_v51 }
  0xfc   : > { %696 = vst.msk [vmem:[%s1051_s13 + $0x20] sm:$0x7f] %vm691_vm0, %v688_v29  ;;  %v676_v9 = vadd.f32 %v669_v7, %v612_v6 }
  0xfd   : > { %v567_v12 = vpop.permute.xlu1 %566 }
  0xfe   : > { %v690_v13 = vadd.f32 %v1044_v54, %v676_v9  ;;  %v599_v31 = vmul.f32 %v1028_v34, %v567_v12 }
 0x100   : > { %698 = vst.msk [vmem:[%s1051_s13 + $0x30] sm:$0x7f] %vm691_vm0, %v690_v13  ;;  %v606_v11 = vadd.f32 %v599_v31, %v556_v55 }
 0x101   : > { %v575_v39 = vpop.permute.xlu1 %574 }
 0x102   : > { %v601_v27 = vmul.f32 %v1028_v34, %v575_v39 }
 0x104   : > { %v608_v59 = vadd.f32 %v601_v27, %v558_v14 }
 0x105   : > { %v579_v19 = vpop.permute.xlu1 %578 }
 0x106   : > { %v602_v36 = vmul.f32 %v1028_v34, %v579_v19 }
 0x108   : > { %v609_v25 = vadd.f32 %v602_v36, %v559_v46 }
 0x109   : > { %v587_v40 = vpop.permute.xlu1 %586 }
 0x10a   : > { %v604_v52 = vmul.f32 %v1028_v34, %v587_v40 }
 0x10c   : > { %v611_v60 = vadd.f32 %v604_v52, %v561_v61 }
 0x10e   : > { %v625_v48 = vpop.permute.xlu1 %624 }
 0x10f   : > { %v663_v5 = vmul.f32 %v1034_v44, %v625_v48 }
 0x111   : > { %v670_v32 = vadd.f32 %v663_v5, %v606_v11 }
 0x112   : > { %v635_v41 = vpop.permute.xlu1 %634 }
 0x113   : > { %v684_v45 = vadd.f32 %v1044_v54, %v670_v32  ;;  %v665_v18 = vmul.f32 %v1034_v44, %v635_v41 }
 0x115   : > { %692 = vst.msk [vmem:[%s1051_s13] sm:$0x7f] %vm691_vm0, %v684_v45  ;;  %v672_v50 = vadd.f32 %v665_v18, %v608_v59 }
 0x116   : > { %v640_v62 = vpop.permute.xlu1 %639 }
 0x117   : > { %v686_v56 = vadd.f32 %v1044_v54, %v672_v50  ;;  %v666_v58 = vmul.f32 %v1034_v44, %v640_v62 }
 0x119   : > { %694 = vst.msk [vmem:[%s1051_s13 + $0x10] sm:$0x7f] %vm691_vm0, %v686_v56  ;;  %v673_v22 = vadd.f32 %v666_v58, %v609_v25 }
 0x11a   : > { %v650_v10 = vpop.permute.xlu1 %649 }
 0x11b   : > { %v687_v63 = vadd.f32 %v1044_v54, %v673_v22  ;;  %v668_v0 = vmul.f32 %v1034_v44, %v650_v10 }
 0x11d   : > { %695 = vst.msk [vmem:[%s1051_s13 + $0x18] sm:$0x7f] %vm691_vm0, %v687_v63  ;;  %v675_v1 = vadd.f32 %v668_v0, %v611_v60 }
 0x11f   : > { %v689_v2 = vadd.f32 %v1044_v54, %v675_v1 }
 0x121   : > { %697 = vst.msk [vmem:[%s1051_s13 + $0x28] sm:$0x7f] %vm691_vm0, %v689_v2 }
 0x122 PF: > { %s13_s12 = sadd.s32 1, %s829_s12  }
 0x123   : > { %p10_p4 = scmp.ge.s32.totalorder %s13_s12, 4  }
 0x125   :  { %12 = sbr.rel (!%p10_p4) target bundleno = 1 (0x1), region = 71 }

</bundles_post_ra>
